<compile_context>
chip_gen: v7x
topology: tpu7x:2x2x1
jax: 0.10.0
libtpu: 0.0.40
codegen_flags: <defaults>
</compile_context>

<pallas_src>
import functools

import jax
import jax.numpy as jnp
from jax.experimental import pallas as pl
from jax.experimental.pallas import tpu as pltpu

SUBLANE = 8
LANE = 128
MAX_BLOCK_B = 4096  # VMEM cap: ~2 KB/row live -> <~10 MB/block, safe on v7x (64 MiB).


def _round_up(n, m):
    return ((n + m - 1) // m) * m


def _cdiv(a, b):
    return -(-a // b)


def dqn_kernel(x_ref, w1_ref, b1_ref, w2_ref, b2_ref, w3_ref, b3_ref, o_ref):
    # Biases loaded once (f32) — no re-broadcast if the body ever grows a loop.
    b1 = b1_ref[...]
    b2 = b2_ref[...]
    b3 = b3_ref[...]

    # fc1 + ReLU. x and w1 stay f32 (K = state_dim is tiny; casting x to bf16
    # costs VPU work and a half-packed tile for negligible DMA savings).
    h1 = jnp.dot(x_ref[...], w1_ref[...], preferred_element_type=jnp.float32)
    h1 = jnp.maximum(h1 + b1, 0.0)

    # fc2 + ReLU (bf16 MXU inputs, f32 accumulate; bias/ReLU in f32).
    h2 = jnp.dot(h1.astype(jnp.bfloat16), w2_ref[...],
                 preferred_element_type=jnp.float32)
    h2 = jnp.maximum(h2 + b2, 0.0)

    # fc3 (no activation). Output dim is lane-padded to a multiple of 128 and
    # stored in bf16 to halve the HBM write traffic.
    q = jnp.dot(h2.astype(jnp.bfloat16), w3_ref[...],
                preferred_element_type=jnp.float32) + b3
    o_ref[...] = q.astype(o_ref.dtype)


@functools.partial(jax.jit, static_argnames=("action_dim", "block_b"))
def dqn_forward(x, params, action_dim, block_b=1024):
    """Fused 3-layer MLP forward (== torch DQN.forward).

    x: (B, state_dim) float. params from init_params (w1/b1 f32, w2/w3 bf16,
    biases f32; fc3 lane-padded). Returns (B, action_dim) f32 Q-values.
    """
    w1, b1, w2, b2, w3, b3 = params
    B, S = x.shape
    H = w1.shape[1]
    A_pad = w3.shape[1]

    x = x.astype(jnp.float32)
    weights = (w1, b1, w2, b2, w3, b3)
    w_bytes = sum(int(a.size) * a.dtype.itemsize for a in weights)

    # Sanitize block_b: must be a sublane multiple for the (8,128) tiling rule.
    block_b = max(SUBLANE, _round_up(int(block_b), SUBLANE))

    # Pad batch to a sublane multiple so every block is (8k, ...).
    Bp = _round_up(max(B, 1), SUBLANE)

    if Bp <= block_b:
        # Small batch: a single grid-less block — no per-step overhead.
        if Bp != B:
            x = jnp.pad(x, ((0, Bp - B), (0, 0)))
        flops = 2 * Bp * (S * H + H * H + H * A_pad)
        bytes_accessed = int(x.size) * 4 + w_bytes + Bp * A_pad * 2
        out = pl.pallas_call(
            dqn_kernel,
            out_shape=jax.ShapeDtypeStruct((Bp, A_pad), jnp.bfloat16),
            grid=(),
            in_specs=[pl.BlockSpec((Bp, S), lambda: (0, 0))]
                     + [pl.BlockSpec(a.shape, lambda: (0, 0)) for a in weights],
            out_specs=pl.BlockSpec((Bp, A_pad), lambda: (0, 0)),
            cost_estimate=pl.CostEstimate(flops=flops, transcendentals=0,
                                          bytes_accessed=bytes_accessed),
        )(x, *weights)
    else:
        # Large batch: always take the 1-D batch grid (never a whole-batch block).
        # At least 2 blocks so dimension_semantics=("parallel",) can shard across
        # v7x's two TensorCores; block rows sized to minimize zero-padding and
        # capped at MAX_BLOCK_B to keep per-block VMEM small.
        n_blocks = max(2, _cdiv(Bp, block_b))
        blk = _round_up(_cdiv(Bp, n_blocks), SUBLANE)
        blk = min(blk, MAX_BLOCK_B)
        Bg = _round_up(Bp, blk)
        if Bg != B:
            x = jnp.pad(x, ((0, Bg - B), (0, 0)))
        grid = (Bg // blk,)

        flops = 2 * Bg * (S * H + H * H + H * A_pad)
        bytes_accessed = int(x.size) * 4 + w_bytes + Bg * A_pad * 2

        x_spec = pl.BlockSpec((blk, S), lambda i: (i, 0))
        o_spec = pl.BlockSpec((blk, A_pad), lambda i: (i, 0))
        # Weights/biases never change across the grid -> single-buffered, resident.
        w_specs = [pl.BlockSpec(a.shape, lambda i: (0, 0),
                                pipeline_mode=pl.Buffered(1)) for a in weights]

        out = pl.pallas_call(
            dqn_kernel,
            out_shape=jax.ShapeDtypeStruct((Bg, A_pad), jnp.bfloat16),
            grid=grid,
            in_specs=[x_spec] + w_specs,
            out_specs=o_spec,
            compiler_params=pltpu.CompilerParams(
                dimension_semantics=("parallel",)),
            cost_estimate=pl.CostEstimate(flops=flops, transcendentals=0,
                                          bytes_accessed=bytes_accessed),
        )(x, *weights)

    # TODO(synk): for pure action selection, fuse the argmax over actions into
    # the kernel (or consume the padded bf16 output directly) to avoid this slice.
    return out[:B, :action_dim].astype(jnp.float32)


def init_params(key, state_dim, action_dim, hidden_dim):
    """Deterministic init mimicking nn.Linear (uniform +-1/sqrt(fan_in)).

    w1 kept f32 (tiny, matches f32 x for fc1); w2/w3 stored bf16 (in, out);
    biases f32 (1, out). fc3 weight/bias are zero-padded along the output dim
    up to a multiple of 128 lanes.
    """
    ks = jax.random.split(key, 6)

    def linear(kw, kb, fan_in, fan_out, w_dtype, pad_out=None):
        bound = 1.0 / jnp.sqrt(fan_in)
        w = jax.random.uniform(kw, (fan_in, fan_out), jnp.float32, -bound, bound)
        b = jax.random.uniform(kb, (1, fan_out), jnp.float32, -bound, bound)
        if pad_out is not None and pad_out != fan_out:
            w = jnp.pad(w, ((0, 0), (0, pad_out - fan_out)))
            b = jnp.pad(b, ((0, 0), (0, pad_out - fan_out)))
        return w.astype(w_dtype), b.astype(jnp.float32)

    a_pad = _round_up(action_dim, LANE)
    w1, b1 = linear(ks[0], ks[1], state_dim, hidden_dim, jnp.float32)
    w2, b2 = linear(ks[2], ks[3], hidden_dim, hidden_dim, jnp.bfloat16)
    w3, b3 = linear(ks[4], ks[5], hidden_dim, action_dim, jnp.bfloat16,
                    pad_out=a_pad)
    return (w1, b1, w2, b2, w3, b3)


def dqn_reference(x, params, action_dim):
    """Pure-JAX reference matching the kernel math (f32 fc1, bf16 fc2/fc3
    inputs with f32 accumulation, bf16 output store)."""
    w1, b1, w2, b2, w3, b3 = params
    x = x.astype(jnp.float32)

    h1 = jnp.maximum(jnp.dot(x, w1.astype(jnp.float32)) + b1, 0.0)
    h2 = jnp.maximum(
        jnp.dot(h1.astype(jnp.bfloat16).astype(jnp.float32),
                w2.astype(jnp.float32)) + b2, 0.0)
    q = jnp.dot(h2.astype(jnp.bfloat16).astype(jnp.float32),
                w3.astype(jnp.float32)) + b3
    q = q.astype(jnp.bfloat16).astype(jnp.float32)
    return q[:, :action_dim]


if __name__ == "__main__":
    # Small shapes consistent with a CarRacing DQN: flat state -> discrete actions.
    batch, state_dim, action_dim, hidden_dim = 8, 8, 5, 256

    key = jax.random.PRNGKey(0)
    k_x, k_p, k_big = jax.random.split(key, 3)
    x = jax.random.normal(k_x, (batch, state_dim), dtype=jnp.float32)
    params = init_params(k_p, state_dim, action_dim, hidden_dim)

    # Small-batch path (grid-less single block).
    out = jax.block_until_ready(dqn_forward(x, params, action_dim))
    ref = dqn_reference(x, params, action_dim)
    assert out.shape == (batch, action_dim)
    assert jnp.allclose(out, ref, atol=2e-2, rtol=2e-2)

    # Larger, non-block-multiple batch: padded 1-D parallel batch grid
    # (>= 2 blocks, weights resident across grid steps, bf16 output).
    xb = jax.random.normal(k_big, (1500, state_dim), dtype=jnp.float32)
    out_b = jax.block_until_ready(dqn_forward(xb, params, action_dim, block_b=512))
    ref_b = dqn_reference(xb, params, action_dim)
    assert out_b.shape == (1500, action_dim)
    assert jnp.allclose(out_b, ref_b, atol=2e-2, rtol=2e-2)

    print("KERNEL_OK")
</pallas_src>

<mosaic_0001>
module attributes {stable_mosaic.version = 11 : i64} {
  func.func @dqn_kernel(%arg0: memref<8x8xf32, #tpu.memory_space<vmem>>, %arg1: memref<8x256xf32, #tpu.memory_space<vmem>>, %arg2: memref<1x256xf32, #tpu.memory_space<vmem>>, %arg3: memref<256x256xbf16, #tpu.memory_space<vmem>>, %arg4: memref<1x256xf32, #tpu.memory_space<vmem>>, %arg5: memref<256x128xbf16, #tpu.memory_space<vmem>>, %arg6: memref<1x128xf32, #tpu.memory_space<vmem>>, %arg7: memref<8x128xbf16, #tpu.memory_space<vmem>>) attributes {dimension_semantics = [], scalar_prefetch = 0 : i64, scratch_operands = 0 : i64, tpu.core_type = #tpu.core_type<tc>} {
    %c0 = arith.constant 0 : index
    %c0_0 = arith.constant 0 : index
    %0 = vector.load %arg2[%c0, %c0_0] : memref<1x256xf32, #tpu.memory_space<vmem>>, vector<1x256xf32>
    %c0_1 = arith.constant 0 : index
    %c0_2 = arith.constant 0 : index
    %1 = vector.load %arg4[%c0_1, %c0_2] : memref<1x256xf32, #tpu.memory_space<vmem>>, vector<1x256xf32>
    %c0_3 = arith.constant 0 : index
    %c0_4 = arith.constant 0 : index
    %2 = vector.load %arg6[%c0_3, %c0_4] : memref<1x128xf32, #tpu.memory_space<vmem>>, vector<1x128xf32>
    %c0_5 = arith.constant 0 : index
    %c0_6 = arith.constant 0 : index
    %3 = vector.load %arg0[%c0_5, %c0_6] : memref<8x8xf32, #tpu.memory_space<vmem>>, vector<8x8xf32>
    %c0_7 = arith.constant 0 : index
    %c0_8 = arith.constant 0 : index
    %4 = vector.load %arg1[%c0_7, %c0_8] : memref<8x256xf32, #tpu.memory_space<vmem>>, vector<8x256xf32>
    %cst = arith.constant dense<0.000000e+00> : vector<8x256xf32>
    %5 = tpu.matmul %3, %4, %cst {dimension_numbers = #tpu.dot_dimension_numbers<[1], [0], [0], [1], [0, 0, 1, 1], [], []>} : vector<8x8xf32>, vector<8x256xf32>, vector<8x256xf32> -> vector<8x256xf32>
    %6 = vector.broadcast %0 : vector<1x256xf32> to vector<8x256xf32>
    %7 = arith.addf %5, %6 : vector<8x256xf32>
    %cst_9 = arith.constant 0.000000e+00 : f32
    %8 = vector.broadcast %cst_9 : f32 to vector<8x256xf32>
    %9 = arith.maximumf %7, %8 : vector<8x256xf32>
    %10 = arith.truncf %9 : vector<8x256xf32> to vector<8x256xbf16>
    %c0_10 = arith.constant 0 : index
    %c0_11 = arith.constant 0 : index
    %11 = vector.load %arg3[%c0_10, %c0_11] : memref<256x256xbf16, #tpu.memory_space<vmem>>, vector<256x256xbf16>
    %cst_12 = arith.constant dense<0.000000e+00> : vector<8x256xf32>
    %12 = tpu.matmul %10, %11, %cst_12 {dimension_numbers = #tpu.dot_dimension_numbers<[1], [0], [0], [1], [0, 0, 1, 1], [], []>} : vector<8x256xbf16>, vector<256x256xbf16>, vector<8x256xf32> -> vector<8x256xf32>
    %13 = vector.broadcast %1 : vector<1x256xf32> to vector<8x256xf32>
    %14 = arith.addf %12, %13 : vector<8x256xf32>
    %cst_13 = arith.constant 0.000000e+00 : f32
    %15 = vector.broadcast %cst_13 : f32 to vector<8x256xf32>
    %16 = arith.maximumf %14, %15 : vector<8x256xf32>
    %17 = arith.truncf %16 : vector<8x256xf32> to vector<8x256xbf16>
    %c0_14 = arith.constant 0 : index
    %c0_15 = arith.constant 0 : index
    %18 = vector.load %arg5[%c0_14, %c0_15] : memref<256x128xbf16, #tpu.memory_space<vmem>>, vector<256x128xbf16>
    %cst_16 = arith.constant dense<0.000000e+00> : vector<8x128xf32>
    %19 = tpu.matmul %17, %18, %cst_16 {dimension_numbers = #tpu.dot_dimension_numbers<[1], [0], [0], [1], [0, 0, 1, 1], [], []>} : vector<8x256xbf16>, vector<256x128xbf16>, vector<8x128xf32> -> vector<8x128xf32>
    %20 = vector.broadcast %2 : vector<1x128xf32> to vector<8x128xf32>
    %21 = arith.addf %19, %20 : vector<8x128xf32>
    %22 = arith.truncf %21 : vector<8x128xf32> to vector<8x128xbf16>
    %c0_17 = arith.constant 0 : index
    %c0_18 = arith.constant 0 : index
    %23 = vector.load %arg7[%c0_17, %c0_18] : memref<8x128xbf16, #tpu.memory_space<vmem>>, vector<8x128xbf16>
    tpu.vector_store %arg7[%c0_17, %c0_18], %22 {strides = array<i32>} : memref<8x128xbf16, #tpu.memory_space<vmem>>, vector<8x128xbf16>,
    return
  }
}

</mosaic_0001>

<bundles_post_ra>
// kernel: dqn_forward.1
= control target key start
LH: loop header
LB: loop body
LE: loop exit
PB: predicated region body
PF: predicated region fallthrough
CT: control target
= control target key end

     0   :  { %12 = vsyncpa [#allocation3], 0  ;;  %s953_s0 = inlined_call_operand.hbm [shape: f32[8,8], index: 0, kind: input, shape index: {}]   ;;  %s954_s1 = inlined_call_operand.hbm [shape: f32[8,256], index: 1, kind: input, shape index: {}]   ;;  %s955_s2 = inlined_call_operand.vmem [shape: f32[1,256], index: 2, kind: input, shape index: {}]   ;;  %s956_s3 = inlined_call_operand.hbm [shape: bf16[256,256], index: 3, kind: input, shape index: {}]   ;;  %s957_s4 = inlined_call_operand.vmem [shape: f32[1,256], index: 4, kind: input, shape index: {}]   ;;  %s958_s5 = inlined_call_operand.hbm [shape: bf16[256,128], index: 5, kind: input, shape index: {}]   ;;  %s959_s6 = inlined_call_operand.vmem [shape: f32[1,128], index: 6, kind: input, shape index: {}]   ;;  %s960_s7 = inlined_call_operand.vmem [shape: bf16[8,128], index: 7, kind: output, shape index: {}]  }
   0x1   :  { %13 = vsyncpa [#allocation5], 0 }
   0x2   :  { %14 = vsyncpa [#allocation8], 0  ;;  %s844_s24 = smov [#allocation4]   ;;  %s845_s26 = smov [#allocation2]  }
   0x3   :  { %s31_s25 = sshll.u32 %s844_s24, 4  ;;  %s21_s27 = sshll.u32 %s845_s26, 4  ;;  %s32_s25 = int_to_ptr.vmem [resolvable:$true] %s31_s25  ;;  %s22_s27 = int_to_ptr.vmem [resolvable:$true] %s21_s27 }
   0x4   :  { %s750_s30 = scalar_lea.hbm %s954_s1, 256 }
   0x5   :  { %p751_p0 = scmp.ne.s32.totalorder %s954_s1, %s750_s30  ;;  %p754_p1 = scmp.lt.u32.totalorder %s750_s30, %s954_s1 }
   0x7   :  { %p756_p2 = pnand %p754_p1, %p751_p0 }
   0x9   :  { %759 = shalt.err (!%p756_p2)
}
   0xa   :  { %s760_s12 = scalar_lea.vmem %s32_s25, 256  ;;  %p765_p4 = scmp.lt.s32.totalorder %s32_s25, %s32_s25 }
   0xb   :  { %p761_p3 = scmp.ne.s32.totalorder %s32_s25, %s760_s12  ;;  %p766_p5 = scmp.lt.s32.totalorder %s760_s12, %s760_s12 }
   0xd   :  { %p767_p6 = por %p766_p5, %p765_p4 }
   0xf   :  { %p768_p7 = pnand %p767_p6, %p761_p3 }
  0x11   :  { %771 = shalt.err (!%p768_p7)
}
  0x12   :  { %34 = dma.hbm_to_vmem [thread:$0]  %s954_s1, 256, %s32_s25, [#allocation5]  }
  0x13   :  { %s772_s17 = scalar_lea.hbm %s953_s0, 128 }
  0x14   :  { %p773_p8 = scmp.ne.s32.totalorder %s953_s0, %s772_s17  ;;  %p776_p9 = scmp.lt.u32.totalorder %s772_s17, %s953_s0 }
  0x16   :  { %p778_p10 = pnand %p776_p9, %p773_p8 }
  0x18   :  { %781 = shalt.err (!%p778_p10)
}
  0x19   :  { %s782_s22 = scalar_lea.vmem %s22_s27, 128  ;;  %p787_p12 = scmp.lt.s32.totalorder %s22_s27, %s22_s27 }
  0x1a   :  { %p783_p11 = scmp.ne.s32.totalorder %s22_s27, %s782_s22  ;;  %p788_p13 = scmp.lt.s32.totalorder %s782_s22, %s782_s22 }
  0x1c   :  { %p789_p0 = por %p788_p13, %p787_p12 }
  0x1e   :  { %p790_p1 = pnand %p789_p0, %p783_p11 }
  0x20   :  { %793 = shalt.err (!%p790_p1)
}
  0x21   :  { %24 = dma.hbm_to_vmem [thread:$0]  %s953_s0, 128, %s22_s27, [#allocation3]  }
  0x22   :  { %s846_s24 = smov [#allocation6]   ;;  %s794_s29 = scalar_lea.hbm %s956_s3, 4096 }
  0x23   :  { %s42_s25 = sshll.u32 %s846_s24, 4  ;;  %p795_p2 = scmp.ne.s32.totalorder %s956_s3, %s794_s29  ;;  %s43_s25 = int_to_ptr.vmem [resolvable:$true] %s42_s25 }
  0x24   :  { %p798_p3 = scmp.lt.u32.totalorder %s794_s29, %s956_s3 }
  0x26   :  { %p800_p4 = pnand %p798_p3, %p795_p2 }
  0x28   :  { %803 = shalt.err (!%p800_p4)
}
  0x29   :  { %s804_s11 = scalar_lea.vmem %s43_s25, 4096  ;;  %p809_p6 = scmp.lt.s32.totalorder %s43_s25, %s43_s25 }
  0x2a   :  { %p805_p5 = scmp.ne.s32.totalorder %s43_s25, %s804_s11  ;;  %p810_p7 = scmp.lt.s32.totalorder %s804_s11, %s804_s11 }
  0x2c   :  { %p811_p8 = por %p810_p7, %p809_p6 }
  0x2e   :  { %p812_p9 = pnand %p811_p8, %p805_p5 }
  0x30   :  { %815 = shalt.err (!%p812_p9)
}
  0x31   :  { %s847_s0 = smov 128   ;;  %s848_s27 = smov 8  }
  0x32   :  { %48 = dma.hbm_to_vmem [thread:$0]  %s956_s3, 4096, %s43_s25, [#allocation5], %s847_s0, %s847_s0, %s848_s27  }
  0x33   :  { %s849_s14 = smov [#allocation7]   ;;  %s816_s18 = scalar_lea.hbm %s958_s5, 2048 }
  0x34   :  { %s56_s15 = sshll.u32 %s849_s14, 4  ;;  %p817_p10 = scmp.ne.s32.totalorder %s958_s5, %s816_s18  ;;  %s57_s15 = int_to_ptr.vmem [resolvable:$true] %s56_s15 }
  0x35   :  { %p820_p11 = scmp.lt.u32.totalorder %s816_s18, %s958_s5 }
  0x37   :  { %p822_p12 = pnand %p820_p11, %p817_p10 }
  0x39   :  { %825 = shalt.err (!%p822_p12)
}
  0x3a   :  { %s826_s1 = scalar_lea.vmem %s57_s15, 2048  ;;  %p831_p0 = scmp.lt.s32.totalorder %s57_s15, %s57_s15 }
  0x3b   :  { %p827_p13 = scmp.ne.s32.totalorder %s57_s15, %s826_s1  ;;  %p832_p1 = scmp.lt.s32.totalorder %s826_s1, %s826_s1 }
  0x3d   :  { %p833_p2 = por %p832_p1, %p831_p0 }
  0x3f   :  { %p834_p3 = pnand %p833_p2, %p827_p13 }
  0x41   :  { %837 = shalt.err (!%p834_p3)
}
  0x42   :  { %s850_s3 = smov 64   ;;  %s851_s23 = smov 4  }
  0x43   :  { %62 = dma.hbm_to_vmem [thread:$0]  %s958_s5, 2048, %s57_s15, [#allocation8], %s850_s3, %s850_s3, %s851_s23  }
  0x44   :  { %838 = dma.done.wait [#allocation3], 128  }
  0x45   :  { %839 = vsyncadd [#allocation3], 4294967168 }
  0x46   :  { %840 = dma.done.wait [#allocation5], 4352  }
  0x47   :  { %841 = vsyncadd [#allocation5], 4294962944 }
  0x48   :  { %842 = dma.done.wait [#allocation8], 2048  }
  0x49   :  { %843 = vsyncadd [#allocation8], 4294965248  ;;  %v852_v0 = vmov 0.0   ;;  %v83_v1 = vld [vmem:[#allocation4 + $0x8] sm:$0xff]  ;;  %v82_v2 = vld [vmem:[#allocation4] sm:$0xff]  ;;  %vm95_vm0 = vcmask 64512   ;;  %v85_v48 = vlaneseq }
  0x4a   :  { %163 = vmatprep.mubr.f32.mxu0 %v852_v0  ;;  %v81_v3 = vld [vmem:[#allocation2] sm:$0xff]  ;;  %99 = vmatprep.subr.mxu0 %v83_v1  ;;  %v689_v6 = vld [vmem:[#allocation6 + $0x14] ss:$8 sps:$4 sm:$0xff]   ;;  %v691_v7 = vld [vmem:[#allocation6 + $0x10] ss:$8 sps:$4 sm:$0xff]  }
  0x4b   :  { %v686_v4 = vld [vmem:[#allocation6 + $0x4] ss:$8 sps:$4 sm:$0xff]   ;;  %100 = vmatpush1.msra.mxu0 %v82_v2  ;;  %v688_v5 = vld [vmem:[#allocation6] ss:$8 sps:$4 sm:$0xff]   ;;  %v695_v10 = vld [vmem:[#allocation6 + $0x34] ss:$8 sps:$4 sm:$0xff]  }
  0x4c   :  { %605 = vmatmul.mubr.msk.f32.vlgmr.msra.gmra.mrb[0].mxu0 %vm95_vm0, %v81_v3  ;;  %377 = vmatprep.subr.bf16.mxu1 %v686_v4  ;;  %v692_v8 = vld [vmem:[#allocation6 + $0x24] ss:$8 sps:$4 sm:$0xff]   ;;  %v694_v9 = vld [vmem:[#allocation6 + $0x20] ss:$8 sps:$4 sm:$0xff]   ;;  %v697_v11 = vld [vmem:[#allocation6 + $0x30] ss:$8 sps:$4 sm:$0xff]  }
  0x4d   :  { %378 = vmatpush1.bf16.msra.mxu1 %v688_v5  ;;  %v698_v12 = vld [vmem:[#allocation6 + $0x44] ss:$8 sps:$4 sm:$0xff]   ;;  %v700_v13 = vld [vmem:[#allocation6 + $0x40] ss:$8 sps:$4 sm:$0xff]   ;;  %v701_v14 = vld [vmem:[#allocation6 + $0x54] ss:$8 sps:$4 sm:$0xff]  }
  0x4e   :  { %379 = vmatprep.subr.bf16.mxu1 %v689_v6  ;;  %v703_v15 = vld [vmem:[#allocation6 + $0x50] ss:$8 sps:$4 sm:$0xff]   ;;  %v704_v16 = vld [vmem:[#allocation6 + $0x64] ss:$8 sps:$4 sm:$0xff]   ;;  %v706_v17 = vld [vmem:[#allocation6 + $0x60] ss:$8 sps:$4 sm:$0xff]  }
  0x4f   :  { %v707_v18 = vld [vmem:[#allocation6 + $0x74] ss:$8 sps:$4 sm:$0xff]   ;;  %v709_v19 = vld [vmem:[#allocation6 + $0x70] ss:$8 sps:$4 sm:$0xff]   ;;  %v710_v20 = vld [vmem:[#allocation6 + $0x84] ss:$8 sps:$4 sm:$0xff]  }
  0x50   :  { %v712_v21 = vld [vmem:[#allocation6 + $0x80] ss:$8 sps:$4 sm:$0xff]   ;;  %v713_v22 = vld [vmem:[#allocation6 + $0x94] ss:$8 sps:$4 sm:$0xff]   ;;  %v715_v23 = vld [vmem:[#allocation6 + $0x90] ss:$8 sps:$4 sm:$0xff]  }
  0x51   :  { %380 = vmatpush1.bf16.msra.mxu1 %v691_v7  ;;  %v716_v24 = vld [vmem:[#allocation6 + $0xa4] ss:$8 sps:$4 sm:$0xff]   ;;  %v718_v25 = vld [vmem:[#allocation6 + $0xa0] ss:$8 sps:$4 sm:$0xff]   ;;  %v719_v26 = vld [vmem:[#allocation6 + $0xb4] ss:$8 sps:$4 sm:$0xff]  }
  0x52   :  { %381 = vmatprep.subr.bf16.mxu1 %v692_v8  ;;  %v721_v27 = vld [vmem:[#allocation6 + $0xb0] ss:$8 sps:$4 sm:$0xff]   ;;  %v722_v28 = vld [vmem:[#allocation6 + $0xc4] ss:$8 sps:$4 sm:$0xff]   ;;  %v724_v29 = vld [vmem:[#allocation6 + $0xc0] ss:$8 sps:$4 sm:$0xff]  }
  0x53   :  { %v725_v30 = vld [vmem:[#allocation6 + $0xd4] ss:$8 sps:$4 sm:$0xff]   ;;  %v727_v31 = vld [vmem:[#allocation6 + $0xd0] ss:$8 sps:$4 sm:$0xff]   ;;  %v728_v32 = vld [vmem:[#allocation6 + $0xe4] ss:$8 sps:$4 sm:$0xff]  }
  0x54   :  { %v730_v33 = vld [vmem:[#allocation6 + $0xe0] ss:$8 sps:$4 sm:$0xff]   ;;  %v731_v34 = vld [vmem:[#allocation6 + $0xf4] ss:$8 sps:$4 sm:$0xff]   ;;  %v733_v35 = vld [vmem:[#allocation6 + $0xf0] ss:$8 sps:$4 sm:$0xff]  }
  0x55   :  { %382 = vmatpush1.bf16.msra.mxu1 %v694_v9  ;;  %v734_v36 = vld [vmem:[#allocation7 + $0x40] sm:$0xff]   ;;  %v736_v38 = vld [vmem:[#allocation7 + $0x48] sm:$0xff]   ;;  %v738_v40 = vld [vmem:[#allocation7 + $0x50] sm:$0xff]   ;;  %v86_v49 = vshrl.u32 %v85_v48, 7 }
  0x56   :  { %383 = vmatprep.subr.bf16.mxu1 %v695_v10  ;;  %v735_v37 = vld [vmem:[#allocation7] sm:$0xff]   ;;  %655 = vmatprep.subr.bf16.mxu0 %v734_v36  ;;  %v737_v39 = vld [vmem:[#allocation7 + $0x8] sm:$0xff]   ;;  %v739_v41 = vld [vmem:[#allocation7 + $0x10] sm:$0xff]  }
  0x57   :  { %656 = vmatpush3.bf16.msra.mxu0 %v735_v37  ;;  %v740_v42 = vld [vmem:[#allocation7 + $0x58] sm:$0xff]   ;;  %v742_v44 = vld [vmem:[#allocation7 + $0x60] sm:$0xff]   ;;  %v744_v46 = vld [vmem:[#allocation7 + $0x68] sm:$0xff]   ;;  %v87_v50 = vsub.s32 0, %v86_v49  ;;  %v91_v52 = vsub.s32 1, %v86_v49 }
  0x58   :  { %657 = vmatprep.subr.bf16.mxu0 %v736_v38  ;;  %v741_v43 = vld [vmem:[#allocation7 + $0x18] sm:$0xff]   ;;  %v743_v45 = vld [vmem:[#allocation7 + $0x20] sm:$0xff]   ;;  %v745_v47 = vld [vmem:[#allocation7 + $0x28] sm:$0xff]  }
  0x59   :  { %384 = vmatpush1.bf16.msra.mxu1 %v697_v11  ;;  %v78_v51 = vld [vmem:[%s955_s2] sm:$0x3]  ;;  %v746_v63 = vld [vmem:[#allocation7 + $0x70] sm:$0xff]   ;;  %v748_v1 = vld [vmem:[#allocation7 + $0x78] sm:$0xff]  }
  0x5a   :  { %385 = vmatprep.subr.bf16.mxu1 %v698_v12  ;;  %v88_v53 = vrot.slane %v78_v51, %v87_v50  ;;  %v92_v54 = vrot.slane %v78_v51, %v91_v52  ;;  %v747_v0 = vld [vmem:[#allocation7 + $0x30] sm:$0xff]   ;;  %v749_v2 = vld [vmem:[#allocation7 + $0x38] sm:$0xff]   ;;  %v79_v3 = vld [vmem:[%s957_s4] sm:$0x3] }
  0x5b   :  { %658 = vmatpush3.bf16.msra.mxu0 %v737_v39  ;;  %v210_v4 = vrot.slane %v79_v3, %v87_v50  ;;  %v214_v5 = vrot.slane %v79_v3, %v91_v52 }
  0x5c   :  { %659 = vmatprep.subr.bf16.mxu0 %v738_v40 }
  0x5d   :  { %386 = vmatpush1.bf16.msra.mxu1 %v700_v13 }
  0x5e   :  { %387 = vmatprep.subr.bf16.mxu1 %v701_v14 }
  0x5f   :  { %660 = vmatpush3.bf16.msra.mxu0 %v739_v41 }
  0x60   :  { %661 = vmatprep.subr.bf16.mxu0 %v740_v42 }
  0x61   :  { %388 = vmatpush1.bf16.msra.mxu1 %v703_v15 }
  0x62   :  { %389 = vmatprep.subr.bf16.mxu1 %v704_v16 }
  0x63   :  { %662 = vmatpush3.bf16.msra.mxu0 %v741_v43 }
  0x64   :  { %663 = vmatprep.subr.bf16.mxu0 %v742_v44 }
  0x65   :  { %390 = vmatpush1.bf16.msra.mxu1 %v706_v17  ;;  %v638_v17 = vld [vmem:[%s959_s6] ss:$0 sm:$0xff] }
  0x66   :  { %391 = vmatprep.subr.bf16.mxu1 %v707_v18 }
  0x67   :  { %664 = vmatpush3.bf16.msra.mxu0 %v743_v45 }
  0x68   :  { %665 = vmatprep.subr.bf16.mxu0 %v744_v46 }
  0x69   :  { %392 = vmatpush1.bf16.msra.mxu1 %v709_v19 }
  0x6a   :  { %393 = vmatprep.subr.bf16.mxu1 %v710_v20 }
  0x6b   :  { %666 = vmatpush3.bf16.msra.mxu0 %v745_v47 }
  0x6c   :  { %667 = vmatprep.subr.bf16.mxu0 %v746_v63 }
  0x6d   :  { %394 = vmatpush1.bf16.msra.mxu1 %v712_v21 }
  0x6e   :  { %395 = vmatprep.subr.bf16.mxu1 %v713_v22 }
  0x6f   :  { %668 = vmatpush3.bf16.msra.mxu0 %v747_v0 }
  0x70   :  { %669 = vmatprep.subr.bf16.mxu0 %v748_v1 }
  0x71   :  { %396 = vmatpush1.bf16.msra.mxu1 %v715_v23 }
  0x72   :  { %397 = vmatprep.subr.bf16.mxu1 %v716_v24 }
  0x73   :  { %670 = vmatpush3.bf16.msra.mxu0 %v749_v2 }
  0x75   :  { %398 = vmatpush1.bf16.msra.mxu1 %v718_v25 }
  0x76   :  { %399 = vmatprep.subr.bf16.mxu1 %v719_v26 }
  0x79   :  { %400 = vmatpush1.bf16.msra.mxu1 %v721_v27 }
  0x7a   :  { %401 = vmatprep.subr.bf16.mxu1 %v722_v28 }
  0x7d   :  { %402 = vmatpush1.bf16.msra.mxu1 %v724_v29 }
  0x7e   :  { %403 = vmatprep.subr.bf16.mxu1 %v725_v30 }
  0x81   :  { %404 = vmatpush1.bf16.msra.mxu1 %v727_v31 }
  0x82   :  { %405 = vmatprep.subr.bf16.mxu1 %v728_v32 }
  0x85   :  { %406 = vmatpush1.bf16.msra.mxu1 %v730_v33 }
  0x86   :  { %407 = vmatprep.subr.bf16.mxu1 %v731_v34 }
  0x89   :  { %408 = vmatpush1.bf16.msra.mxu1 %v733_v35 }
 0x11f   :  { %v165_v55 = vpop.f32.mrb[0].mxu0 }
 0x120   :  { %v166_v56 = vadd.f32 %v165_v55, %v88_v53  ;;  %v167_v57 = vpop.f32.mrb[1].mxu0 }
 0x121   :  { %v168_v58 = vadd.f32 %v167_v57, %v92_v54 }
 0x122   :  { %v170_v59 = vmax.f32 %v166_v56, 0.0 }
 0x123   :  { %v171_v60 = vmax.f32 %v168_v58, 0.0 }
 0x124   :  { %v172_v62 = vpack.c.bf16 %v170_v59, %v170_v59 }
 0x125   :  { %v173_v61 = vpack.c.bf16 %v171_v60, %v171_v60 }
 0x127   :  { %409 = vmatprep.mubr.bf16.mxu1 %v173_v61 }
 0x128   :  { %410 = vmatmul.mubr.bf16.vlgmr.msra.gmra.mrb[0].mxu1 %v172_v62 }
 0x1fb   :  { %v411_v6 = vpop.f32.mrb[0].mxu1 }
 0x1fc   :  { %v412_v7 = vadd.f32 %v411_v6, %v210_v4  ;;  %v413_v8 = vpop.f32.mrb[1].mxu1 }
 0x1fd   :  { %v414_v9 = vadd.f32 %v413_v8, %v214_v5  ;;  %v415_v10 = vpop.f32.mrb[2].mxu1 }
 0x1fe   :  { %v418_v11 = vmax.f32 %v412_v7, 0.0  ;;  %v416_v12 = vpop.f32.mrb[3].mxu1 }
 0x1ff   :  { %v419_v13 = vmax.f32 %v414_v9, 0.0 }
 0x200   :  { %v420_v15 = vpack.c.bf16 %v418_v11, %v418_v11 }
 0x201   :  { %v421_v14 = vpack.c.bf16 %v419_v13, %v419_v13 }
 0x203   :  { %588 = vmatprep.mubr.bf16.mxu0 %v421_v14 }
 0x204   :  { %589 = vmatmul.mubr.bf16.vlgmr.msra.gmra.mrb[4].mxu0 %v420_v15 }
 0x2d7   :  { %v671_v16 = vpop.f32.mrb[4].mxu0 }
 0x2d8   :  { %v672_v18 = vpop.f32.mrb[5].mxu0 }
 0x2d9   :  { %v673_v19 = vadd.f32 %v672_v18, %v671_v16  ;;  %v674_v20 = vpop.f32.mrb[6].mxu0 }
 0x2da   :  { %v675_v21 = vpop.f32.mrb[7].mxu0 }
 0x2db   :  { %v591_v22 = vadd.f32 %v673_v19, %v638_v17 }
 0x2dd   :  { %v596_v23 = vpack.c.bf16 %v591_v22, %v591_v22 }
 0x2df   :  { %597 = vst [vmem:[%s960_s7] sm:$0xf] %v596_v23 }
 0x2e0   :  { %602 = vsyncpa [#allocation3], 1 }
 0x2e1   :  { %603 = vsyncpa [#allocation5], 1 }
 0x2e2   :  { %604 = vsyncpa [#allocation8], 1 }

</bundles_post_ra>
